<compile_context>
chip_gen: v6e
topology: v6e:2x2x1
jax: 0.10.0
libtpu: 0.0.40
codegen_flags: <defaults>
</compile_context>

<pallas_src>
import functools
import math

import jax
import jax.numpy as jnp
from jax import lax
from jax.experimental import pallas as pl
from jax.experimental.pallas import tpu as pltpu

_MASK = -1e30  # large finite negative: avoids -inf -> NaN hazards in online softmax
_VMEM_LIMIT = 48 * 1024 * 1024  # <= v7x 64 MiB physical; ample headroom on v5e/v6e


def _round_up(v, m):
    return (v + m - 1) // m * m


def _qkv_proj_kernel(x_ref, w_ref, b_ref, q_ref, kv_ref, *, ep):
    # x_ref: (1, Ts, Ep); w_ref: (Ep, 3*Ep) bf16, VMEM-resident, pre-transposed +
    # fused, with the 1/sqrt(E) scale folded into the Q columns; b_ref: (1, 3*Ep) f32.
    acc = jnp.dot(x_ref[0].astype(jnp.bfloat16), w_ref[...],
                  preferred_element_type=jnp.float32) + b_ref[...]
    q_ref[0] = acc[:, :ep].astype(q_ref.dtype)       # Q  -> (Ts, Ep)   bf16
    kv_ref[0] = acc[:, ep:].astype(kv_ref.dtype)     # KV -> (Ts, 2*Ep) bf16


def _flash_attn_kernel(q_ref, kv_ref, o_ref, m_scr, l_scr, acc_scr, *, tq, tk, ep):
    qi = pl.program_id(1)
    ki = pl.program_id(2)
    nk = pl.num_programs(2)

    q_start = qi * tq
    q_last = q_start + (tq - 1)
    k_start = ki * tk
    k_last = k_start + (tk - 1)

    @pl.when(ki == 0)
    def _init():
        m_scr[...] = jnp.full_like(m_scr, _MASK)
        l_scr[...] = jnp.zeros_like(l_scr)
        acc_scr[...] = jnp.zeros_like(acc_scr)

    def _scores():
        # q @ k.T without materializing a transpose: contract the last dims.
        # q_ref / kv_ref are already bf16 -> no per-step casts; f32 accumulation.
        return lax.dot_general(
            q_ref[0], kv_ref[0, :, :ep],
            dimension_numbers=(((1,), (1,)), ((), ())),
            preferred_element_type=jnp.float32)          # (tq, tk), f32

    def _accumulate(s):
        m_prev = m_scr[...]
        m_new = jnp.maximum(m_prev, jnp.max(s, axis=-1, keepdims=True))
        alpha = jnp.exp(m_prev - m_new)
        p = jnp.exp(s - m_new)
        l_scr[...] = alpha * l_scr[...] + jnp.sum(p, axis=-1, keepdims=True)
        acc_scr[...] = alpha * acc_scr[...] + jnp.dot(
            p.astype(jnp.bfloat16), kv_ref[0, :, ep:],
            preferred_element_type=jnp.float32)
        m_scr[...] = m_new

    # KV tile entirely at/below the diagonal: fully visible, no mask math.
    @pl.when(k_last <= q_start)
    def _full_tile():
        _accumulate(_scores())

    # KV tile straddling the diagonal: apply the causal mask for this tile only.
    # (Safe because tq == tk: every query row sees at least its own key.)
    @pl.when(jnp.logical_and(k_start <= q_last, k_last > q_start))
    def _diag_tile():
        s = _scores()
        row = lax.broadcasted_iota(jnp.int32, (tq, tk), 0)
        col = lax.broadcasted_iota(jnp.int32, (tq, tk), 1)
        s = jnp.where(col + (k_start - q_start) > row, _MASK, s)
        _accumulate(s)

    # KV tiles fully above the diagonal contribute nothing; their DMA is also
    # avoided by the clamped index_map (the resident block is reused).

    @pl.when(ki == nk - 1)
    def _finalize():
        inv = pl.reciprocal(l_scr[...], approx=True)     # EUP slot, frees VALU
        o_ref[0] = (acc_scr[...] * inv).astype(o_ref.dtype)


def attention_forward(x, wq, bq, wk, bk, wv, bv, *, seq_tile=256):
    """x: (B, S, E); W*: (E, E) in PyTorch (out, in) layout; b*: (E,). -> (B, S, E)."""
    B, S, E = x.shape
    Ep = _round_up(E, 128)                 # lane-dense last dim
    t = min(seq_tile, _round_up(S, 8))     # sequence tile, multiple of 8
    Sp = _round_up(S, t)
    n_s = Sp // t
    scale = 1.0 / math.sqrt(E)             # true embed dim, not padded

    f32 = jnp.float32
    bf16 = jnp.bfloat16

    # Fused, pre-transposed QKV weight (in_padded, 3*out_padded) in bf16;
    # the 1/sqrt(E) scale is folded into the Q projection (weight and bias).
    # NOTE: for very large E, tile the 3*Ep output columns with an extra grid
    # axis instead of keeping the whole weight VMEM-resident.
    w_qkv = jnp.zeros((Ep, 3 * Ep), f32)
    w_qkv = w_qkv.at[:E, 0 * Ep:0 * Ep + E].set(wq.T.astype(f32) * scale)
    w_qkv = w_qkv.at[:E, 1 * Ep:1 * Ep + E].set(wk.T.astype(f32))
    w_qkv = w_qkv.at[:E, 2 * Ep:2 * Ep + E].set(wv.T.astype(f32))
    w_qkv = w_qkv.astype(bf16)
    b_qkv = jnp.zeros((1, 3 * Ep), f32)    # bias kept f32 (added post-matmul)
    b_qkv = b_qkv.at[0, 0 * Ep:0 * Ep + E].set(bq.astype(f32) * scale)
    b_qkv = b_qkv.at[0, 1 * Ep:1 * Ep + E].set(bk.astype(f32))
    b_qkv = b_qkv.at[0, 2 * Ep:2 * Ep + E].set(bv.astype(f32))

    x_p = jnp.zeros((B, Sp, Ep), x.dtype).at[:, :S, :E].set(x)

    # Kernel 1: fused bf16 QKV projection, one MXU pass per (batch, seq-tile).
    # Outputs: Q (B, Sp, Ep) and packed KV (B, Sp, 2*Ep), both bf16.
    q, kv = pl.pallas_call(
        functools.partial(_qkv_proj_kernel, ep=Ep),
        out_shape=(jax.ShapeDtypeStruct((B, Sp, Ep), bf16),
                   jax.ShapeDtypeStruct((B, Sp, 2 * Ep), bf16)),
        grid_spec=pltpu.PrefetchScalarGridSpec(
            num_scalar_prefetch=0,
            grid=(B, n_s),
            in_specs=[
                pl.BlockSpec((1, t, Ep), lambda b, si: (b, si, 0)),        # x tile
                pl.BlockSpec(memory_space=pltpu.MemorySpace.VMEM),         # W_qkv (resident)
                pl.BlockSpec(memory_space=pltpu.MemorySpace.VMEM),         # b_qkv (resident)
            ],
            out_specs=(
                pl.BlockSpec((1, t, Ep), lambda b, si: (b, si, 0)),        # Q tile
                pl.BlockSpec((1, t, 2 * Ep), lambda b, si: (b, si, 0)),    # KV tile
            ),
        ),
        compiler_params=pltpu.CompilerParams(
            dimension_semantics=("parallel", "parallel"),
            vmem_limit_bytes=_VMEM_LIMIT),
    )(x_p, w_qkv, b_qkv)

    # Kernel 2: flash-style causal attention over bf16 Q / packed KV.
    out_p = pl.pallas_call(
        functools.partial(_flash_attn_kernel, tq=t, tk=t, ep=Ep),
        out_shape=jax.ShapeDtypeStruct((B, Sp, Ep), x.dtype),
        grid_spec=pltpu.PrefetchScalarGridSpec(
            num_scalar_prefetch=0,
            grid=(B, n_s, n_s),
            in_specs=[
                # Q tile: resident across the kv axis.
                pl.BlockSpec((1, t, Ep), lambda b, qi, ki: (b, qi, 0)),
                # K+V fetched as one contiguous block; ki clamped to qi so
                # fully-masked above-diagonal steps reuse the resident block
                # (no dead DMA).
                pl.BlockSpec((1, t, 2 * Ep),
                             lambda b, qi, ki: (b, jnp.minimum(ki, qi), 0)),
            ],
            out_specs=pl.BlockSpec((1, t, Ep), lambda b, qi, ki: (b, qi, 0)),
            scratch_shapes=[
                pltpu.VMEM((t, 1), jnp.float32),    # running max m
                pltpu.VMEM((t, 1), jnp.float32),    # running sum l
                pltpu.VMEM((t, Ep), jnp.float32),   # f32 output accumulator
            ],
        ),
        compiler_params=pltpu.CompilerParams(
            dimension_semantics=("parallel", "parallel", "arbitrary"),
            vmem_limit_bytes=_VMEM_LIMIT),
    )(q, kv)

    return out_p[:, :S, :E]


def _init_linear(key, fan_in, fan_out):
    # Deterministic init mimicking nn.Linear's default (uniform in +-1/sqrt(fan_in))
    kw, kb = jax.random.split(key)
    bound = 1.0 / math.sqrt(fan_in)
    w = jax.random.uniform(kw, (fan_out, fan_in), jnp.float32, -bound, bound)
    b = jax.random.uniform(kb, (fan_out,), jnp.float32, -bound, bound)
    return w, b


def _reference(x, wq, bq, wk, bk, wv, bv):
    q = x @ wq.T + bq
    k = x @ wk.T + bk
    v = x @ wv.T + bv
    scores = q @ jnp.swapaxes(k, -1, -2) / math.sqrt(q.shape[-1])
    S = q.shape[1]
    mask = jnp.triu(jnp.full((S, S), -jnp.inf), k=1)
    scores = scores + mask
    scores = jax.nn.softmax(scores, axis=-1)
    return scores @ v


if __name__ == "__main__":
    B, S, E = 2, 8, 32
    key = jax.random.PRNGKey(0)
    kx, kq, kk, kv = jax.random.split(key, 4)

    x = jax.random.normal(kx, (B, S, E), jnp.float32)
    wq, bq = _init_linear(kq, E, E)
    wk, bk = _init_linear(kk, E, E)
    wv, bv = _init_linear(kv, E, E)

    out = attention_forward(x, wq, bq, wk, bk, wv, bv)
    jax.block_until_ready(out)

    ref = _reference(x, wq, bq, wk, bk, wv, bv)
    assert out.shape == (B, S, E)
    # bf16 MXU operands + bf16 QKV intermediate -> bf16-appropriate tolerance.
    err = float(jnp.max(jnp.abs(out - ref)))
    assert jnp.allclose(out, ref, atol=3e-2, rtol=3e-2), f"mismatch vs reference, max abs err {err}"
    print("KERNEL_OK")
</pallas_src>

<mosaic_0001>
module attributes {stable_mosaic.version = 11 : i64} {
  func.func @_qkv_proj_kernel(%arg0: i32, %arg1: i32, %arg2: memref<1x8x128xf32, #tpu.memory_space<vmem>>, %arg3: memref<128x384xbf16, #tpu.memory_space<vmem>>, %arg4: memref<1x384xf32, #tpu.memory_space<vmem>>, %arg5: memref<1x8x128xbf16, #tpu.memory_space<vmem>>, %arg6: memref<1x8x256xbf16, #tpu.memory_space<vmem>>) attributes {dimension_semantics = [#tpu.dimension_semantics<parallel>, #tpu.dimension_semantics<parallel>], iteration_bounds = array<i64: 2, 1>, scalar_prefetch = 0 : i64, scratch_operands = 0 : i64, tpu.core_type = #tpu.core_type<tc>, window_params = [{transform_indices = @transform_0, window_bounds = array<i64: 1, 8, 128>}, {pipeline_mode = #tpu.pipeline_mode<synchronous>, transform_indices = @transform_1, window_bounds = array<i64: 128, 384>}, {pipeline_mode = #tpu.pipeline_mode<synchronous>, transform_indices = @transform_2, window_bounds = array<i64: 1, 384>}, {transform_indices = @transform_3, window_bounds = array<i64: 1, 8, 128>}, {transform_indices = @transform_4, window_bounds = array<i64: 1, 8, 256>}]} {
    %c0 = arith.constant 0 : index
    %c0_0 = arith.constant 0 : index
    %c0_1 = arith.constant 0 : index
    %0 = vector.load %arg2[%c0, %c0_0, %c0_1] : memref<1x8x128xf32, #tpu.memory_space<vmem>>, vector<1x8x128xf32>
    %1 = vector.shape_cast %0 : vector<1x8x128xf32> to vector<8x128xf32>
    %2 = arith.truncf %1 : vector<8x128xf32> to vector<8x128xbf16>
    %c0_2 = arith.constant 0 : index
    %c0_3 = arith.constant 0 : index
    %3 = vector.load %arg3[%c0_2, %c0_3] : memref<128x384xbf16, #tpu.memory_space<vmem>>, vector<128x384xbf16>
    %cst = arith.constant dense<0.000000e+00> : vector<8x384xf32>
    %4 = tpu.matmul %2, %3, %cst {dimension_numbers = #tpu.dot_dimension_numbers<[1], [0], [0], [1], [0, 0, 1, 1], [], []>} : vector<8x128xbf16>, vector<128x384xbf16>, vector<8x384xf32> -> vector<8x384xf32>
    %c0_4 = arith.constant 0 : index
    %c0_5 = arith.constant 0 : index
    %5 = vector.load %arg4[%c0_4, %c0_5] : memref<1x384xf32, #tpu.memory_space<vmem>>, vector<1x384xf32>
    %6 = vector.broadcast %5 : vector<1x384xf32> to vector<8x384xf32>
    %7 = arith.addf %4, %6 : vector<8x384xf32>
    %8 = vector.extract_strided_slice %7 {offsets = [0, 0], sizes = [8, 128], strides = [1, 1]} : vector<8x384xf32> to vector<8x128xf32>
    %9 = arith.truncf %8 : vector<8x128xf32> to vector<8x128xbf16>
    %c0_6 = arith.constant 0 : index
    %c0_7 = arith.constant 0 : index
    %c0_8 = arith.constant 0 : index
    %10 = vector.load %arg5[%c0_6, %c0_7, %c0_8] : memref<1x8x128xbf16, #tpu.memory_space<vmem>>, vector<1x8x128xbf16>
    %11 = vector.shape_cast %10 : vector<1x8x128xbf16> to vector<8x128xbf16>
    %12 = vector.shape_cast %9 : vector<8x128xbf16> to vector<1x8x128xbf16>
    tpu.vector_store %arg5[%c0_6, %c0_7, %c0_8], %12 {strides = array<i32>} : memref<1x8x128xbf16, #tpu.memory_space<vmem>>, vector<1x8x128xbf16>,
    %13 = vector.extract_strided_slice %7 {offsets = [0, 128], sizes = [8, 256], strides = [1, 1]} : vector<8x384xf32> to vector<8x256xf32>
    %14 = arith.truncf %13 : vector<8x256xf32> to vector<8x256xbf16>
    %c0_9 = arith.constant 0 : index
    %c0_10 = arith.constant 0 : index
    %c0_11 = arith.constant 0 : index
    %15 = vector.load %arg6[%c0_9, %c0_10, %c0_11] : memref<1x8x256xbf16, #tpu.memory_space<vmem>>, vector<1x8x256xbf16>
    %16 = vector.shape_cast %15 : vector<1x8x256xbf16> to vector<8x256xbf16>
    %17 = vector.shape_cast %14 : vector<8x256xbf16> to vector<1x8x256xbf16>
    tpu.vector_store %arg6[%c0_9, %c0_10, %c0_11], %17 {strides = array<i32>} : memref<1x8x256xbf16, #tpu.memory_space<vmem>>, vector<1x8x256xbf16>,
    return
  }
  func.func @transform_0(%arg0: i32, %arg1: i32) -> (i32, i32, i32) {
    %c0_i32 = arith.constant 0 : i32
    %c0_i32_0 = arith.constant 0 : i32
    return %arg0, %arg1, %c0_i32 : i32, i32, i32
  }
  func.func @transform_1(%arg0: i32, %arg1: i32) -> (i32, i32) {
    %c0_i32 = arith.constant 0 : i32
    %c0_i32_0 = arith.constant 0 : i32
    %c0_i32_1 = arith.constant 0 : i32
    return %c0_i32, %c0_i32_0 : i32, i32
  }
  func.func @transform_2(%arg0: i32, %arg1: i32) -> (i32, i32) {
    %c0_i32 = arith.constant 0 : i32
    %c0_i32_0 = arith.constant 0 : i32
    %c0_i32_1 = arith.constant 0 : i32
    return %c0_i32, %c0_i32_0 : i32, i32
  }
  func.func @transform_3(%arg0: i32, %arg1: i32) -> (i32, i32, i32) {
    %c0_i32 = arith.constant 0 : i32
    %c0_i32_0 = arith.constant 0 : i32
    return %arg0, %arg1, %c0_i32 : i32, i32, i32
  }
  func.func @transform_4(%arg0: i32, %arg1: i32) -> (i32, i32, i32) {
    %c0_i32 = arith.constant 0 : i32
    %c0_i32_0 = arith.constant 0 : i32
    return %arg0, %arg1, %c0_i32 : i32, i32, i32
  }
}

</mosaic_0001>

<bundles_post_ra>
// kernel: tpu_custom_call.1
= control target key start
LH: loop header
LB: loop body
LE: loop exit
PB: predicated region body
PF: predicated region fallthrough
CT: control target
= control target key end

     0   :  { %s1308_s0 = inlined_call_operand.hbm [shape: f32[2,8,128], index: 0, kind: input, shape index: {}]   ;;  %s1309_s1 = inlined_call_operand.hbm [shape: bf16[128,384], index: 1, kind: input, shape index: {}]   ;;  %s1310_s2 = inlined_call_operand.vmem [shape: f32[1,384], index: 2, kind: input, shape index: {}]   ;;  %s1311_s3 = inlined_call_operand.hbm [shape: bf16[2,8,128], index: 3, kind: output, shape index: {0}]   ;;  %s1312_s4 = inlined_call_operand.hbm [shape: bf16[2,8,256], index: 4, kind: output, shape index: {1}]  }
   0x1   :  { %1314 = sst [smem:[#allocation14_spill]] %s1309_s1 }
   0x2   :  { %10 = vsyncpa [#allocation3], 0 }
   0x3   :  { %12 = vsyncpa [#allocation3 + $0x1], 0 }
   0x4   :  { %13 = vsyncpa [#allocation6], 0 }
   0x5   :  { %14 = vsyncpa [#allocation4], 0 }
   0x6   :  { %16 = vsyncpa [#allocation4 + $0x1], 0 }
   0x7   :  { %17 = vsyncpa [#allocation9], 0 }
   0x8   :  { %19 = vsyncpa [#allocation9 + $0x1], 0  ;;  %s1085_s15 = smov 0   ;;  %s1087_s16 = smov 0  }
   0x9   :  { %s1089_s17 = smov 0   ;;  %s1091_s18 = smov 0  }
   0xa   :  { %s1093_s19 = smov 0   ;;  %s1095_s20 = smov 0  }
   0xb LB: > { %s691_s21 = sadd.s32 4294967295, %s1049_s20   ;;  %s692_s22 = sadd.s32 4294967294, %s1049_s20   ;;  %s1049_s20 = sphi %s1095_s20, %s25_s20   ;;  %s1045_s19 = sphi %s1093_s19, %s1332_s19   ;;  %s1041_s18 = sphi %s1091_s18, %s1331_s18   ;;  %s1037_s17 = sphi %s1089_s17, %s1330_s17   ;;  %s1033_s16 = sphi %s1087_s16, %s1329_s16   ;;  %s1029_s15 = sphi %s1085_s15, %s1328_s15  }
   0xc   : > { %p59_p0 = scmp.ne.s32.totalorder %s1033_s16, %s1029_s15  ;;  %p1119_p1 = scmp.eq.s32.totalorder %s691_s21, 0 }
   0xd   : > { %p1123_p2 = scmp.eq.s32.totalorder %s691_s21, 1  ;;  %p133_p3 = scmp.eq.s32.totalorder %s692_s22, 1 }
   0xe   : > { %p1129_p4 = por %p1119_p1, %p59_p0  ;;  %p693_p5 = scmp.ge.s32.totalorder %s1049_s20, 1 }
   0xf   : > { %p1134_p6 = por %p133_p3, %p59_p0  ;;  %p168_p7 = scmp.lt.s32.totalorder %s1049_s20, 3 }
  0x10   : > { %s1317_s25 = scalar_select %p1129_p4, 1, 0 }
  0x11   : > { %s1318_s26 = scalar_select %p1134_p6, 1, 0 }
  0x12   : > { %p1139_p8 = pnand %p693_p5, %p168_p7  ;;  %s1051_s28 = smov [#allocation5]  }
  0x13   : > { %s180_s29 = sshll.u32 %s1051_s28, 4  ;;  %s37_s5 = sadd.s32 1, %s1045_s19  ;;  %s181_s29 = int_to_ptr.vmem [resolvable:$true] %s180_s29 }
  0x14   : > { %p776_p9 = pneg %p1139_p8  ;;  %s892_s6 = scalar_lea.vmem %s181_s29, 3072 }
  0x15   : > { %p893_p13 = scmp.ne.s32.totalorder %s181_s29, %s892_s6  ;;  %p900_p5 = scmp.lt.s32.totalorder %s181_s29, %s181_s29 }
  0x16   : > { %p1148_p11 = pnand %p776_p9, %p1119_p1  ;;  %p901_p7 = scmp.lt.s32.totalorder %s892_s6, %s892_s6 }
  0x18   : > { %p883_p12 = pneg %p1148_p11  ;;  %p902_p6 = por %p901_p7, %p900_p5 }
  0x1a   : > { %p895_p0 = pnand %p893_p13, %p883_p12 }
  0x1c   : > { %p896_p3 = pneg %p895_p0 }
  0x1e   : > { %p903_p4 = pnand %p902_p6, %p896_p3 }
  0x20   : > { %906 = shalt.err (!%p903_p4)
}
  0x21   : > { %s1052_s7 = smov 192   ;;  %s1053_s8 = smov 12  }
  0x22   : > { %s1321_s1 = sld [smem:[#allocation14_spill]]  ;;  %p39_p6 = scmp.ge.s32.totalorder %s37_s5, 2 }
  0x23   : > { %s46_s11 = sadd.s32 1, %s1037_s17  ;;  %p53_p4 = scmp.ne.s32.totalorder %s1037_s17, %s1033_s16 }
  0x24   : > { %p54_p9 = scmp.eq.s32.totalorder %s1049_s20, 0  ;;  %s1334_s5 = smov (%p39_p6, %s37_s5), 0 }
  0x25   : > { %p1172_p13 = por %p1123_p2, %p53_p4  ;;  %s41_s14 = ssub.s32 %s1045_s19, %s1334_s5 }
  0x26   : > { %p1166_p12 = por %p54_p9, %p53_p4  ;;  %p792_p0 = scmp.lt.s32.totalorder %s1049_s20, 2 }
  0x27   : > { %s197_s21 = sand.u32 1, %s1037_s17  }
  0x28   : > { %779 = dma.hbm_to_vmem [thread:$0]  (!%p1148_p11), %s1321_s1, 3072, %s181_s29, [#allocation6], %s1052_s7, %s1052_s7, %s1053_s8  }
  0x29   : > { %p44_p11 = scmp.eq.s32.totalorder %s41_s14, 0  ;;  %s696_s22 = sshll.u32 %s197_s21, 3 }
  0x2a   : > { %s697_s29 = sshll.u32 %s1045_s19, 7  ;;  %s201_s8 = scalar_lea.vmem [#allocation2], %s696_s22 }
  0x2b   : > { %s1181_s28 = scalar_select %p44_p11, %s1037_s17, %s46_s11  }
  0x2c   : > { %s207_s7 = scalar_lea.hbm %s1308_s0, %s697_s29  ;;  %s209_s9 = sshll.u32 %s201_s8, 4  ;;  %s210_s9 = int_to_ptr.vmem [resolvable:$true] %s209_s9 }
  0x2d   : > { %p1189_p2 = pnand %p792_p0, %p1166_p12  ;;  %s198_s10 = scalar_lea.sflag [#allocation3], %s197_s21 }
  0x2e   : > { %s920_s14 = scalar_lea.vmem %s210_s9, 128  ;;  %s1054_s11 = smov [#allocation2]  }
  0x2f   : > { %p909_p3 = pneg %p1189_p2  ;;  %p921_p5 = scmp.ne.s32.totalorder %s210_s9, %s920_s14 }
  0x30   : > { %s925_s1 = sshll.u32 %s1054_s11, 4  ;;  %s926_s1 = int_to_ptr.vmem [resolvable:$false] %s925_s1 }
  0x31   : > { %p923_p7 = pnand %p921_p5, %p909_p3  ;;  %s927_s29 = scalar_lea.vmem %s926_s1, 256 }
  0x32   : > { %p928_p4 = scmp.lt.s32.totalorder %s210_s9, %s926_s1  ;;  %p929_p9 = scmp.lt.s32.totalorder %s927_s29, %s920_s14 }
  0x33   : > { %p924_p6 = pneg %p923_p7 }
  0x34   : > { %p930_p11 = por %p929_p9, %p928_p4 }
  0x36   : > { %p931_p10 = pnand %p930_p11, %p924_p6 }
  0x38   : > { %934 = shalt.err (!%p931_p10)
}
  0x39   : > { %783 = dma.hbm_to_vmem [thread:$0]  (!%p1189_p2), %s207_s7, 128, %s210_s9, %s198_s10  }
  0x3a   : > { %218 = sbr.rel (%p1139_p8) target bundleno = 333 (0x14d), region = 32  ;;  %s1200_s12 = sand.u32 (!%p1139_p8), 1, %s1033_s16  }
  0x3b   : > { %s699_s21 = sshll.u32 (!%p1139_p8), %s1200_s12, 3  ;;  %s221_s22 = scalar_lea.sflag (!%p1139_p8), [#allocation3], %s1200_s12 }
  0x3c   : > { %s1206_s1 = scalar_lea.vmem (!%p1139_p8), [#allocation2], %s699_s21  ;;  %p1325_p12 = scmp.ne.s32.totalorder (!%p1139_p8), %s1317_s25, 0 }
  0x3f   : > { %1012 = dma.done.wait (%p1325_p12), %s221_s22, 128  }
  0x40   : > { %1014 = vsyncadd (%p1325_p12), %s221_s22, 4294967168 }
  0x41   : > { %1016 = dma.done.wait (%p1119_p1), [#allocation6], 3072  }
  0x42   : > { %1018 = vsyncadd (%p1119_p1), [#allocation6], 4294964224  ;;  %v1055_v0 = vmov 0.0   ;;  %vm1056_vm0 = vmmov 0   ;;  %v1057_v1 = vmov 0   ;;  %v259_v25 = vld [vmem:[%s1206_s1] sm:$0xff]  ;;  %v295_v28 = vlaneseq }
  0x43   : > { %746 = vmatprep.subr.bf16.mxu1 %v1055_v0  ;;  %762 = vmatprep.mubr.msk.bf16.mxu1 %vm1056_vm0, %v1055_v0  ;;  %v849_v2 = vld [vmem:[#allocation5 + $0xac] ss:$12 sps:$4 sm:$0xff]   ;;  %v851_v3 = vld [vmem:[#allocation5 + $0xb0] ss:$12 sps:$4 sm:$0xff]   ;;  %v852_v4 = vld [vmem:[#allocation5 + $0xa8] ss:$12 sps:$4 sm:$0xff]   ;;  %v260_v27 = vpack.c.bf16 %v259_v25, %v259_v25 }
  0x44   : > { %470 = vmatprep.mubr.bf16.mxu0 %v1057_v1  ;;  %438 = vmatprep.subr.bf16.mxu0 %v849_v2  ;;  %v853_v5 = vld [vmem:[#allocation5 + $0x94] ss:$12 sps:$4 sm:$0xff]   ;;  %v855_v6 = vld [vmem:[#allocation5 + $0x98] ss:$12 sps:$4 sm:$0xff]   ;;  %v856_v7 = vld [vmem:[#allocation5 + $0x90] ss:$12 sps:$4 sm:$0xff]  }
  0x45   : > { %747 = vmatpush3.bf16.msra.mxu1 %v851_v3  ;;  %439 = vmatpush1.bf16.msra.mxu0 %v852_v4  ;;  %v857_v8 = vld [vmem:[#allocation5 + $0x7c] ss:$12 sps:$4 sm:$0xff]   ;;  %v859_v9 = vld [vmem:[#allocation5 + $0x80] ss:$12 sps:$4 sm:$0xff]   ;;  %v860_v10 = vld [vmem:[#allocation5 + $0x78] ss:$12 sps:$4 sm:$0xff]  }
  0x46   : > { %748 = vmatprep.subr.bf16.mxu1 %v1055_v0  ;;  %440 = vmatprep.subr.bf16.mxu0 %v853_v5  ;;  %v861_v11 = vld [vmem:[#allocation5 + $0x64] ss:$12 sps:$4 sm:$0xff]   ;;  %v863_v12 = vld [vmem:[#allocation5 + $0x68] ss:$12 sps:$4 sm:$0xff]   ;;  %v864_v13 = vld [vmem:[#allocation5 + $0x60] ss:$12 sps:$4 sm:$0xff]  }
  0x47   : > { %v865_v14 = vld [vmem:[#allocation5 + $0x4c] ss:$12 sps:$4 sm:$0xff]   ;;  %v867_v15 = vld [vmem:[#allocation5 + $0x50] ss:$12 sps:$4 sm:$0xff]   ;;  %v868_v16 = vld [vmem:[#allocation5 + $0x48] ss:$12 sps:$4 sm:$0xff]  }
  0x48   : > { %v869_v17 = vld [vmem:[#allocation5 + $0x34] ss:$12 sps:$4 sm:$0xff]   ;;  %v871_v18 = vld [vmem:[#allocation5 + $0x38] ss:$12 sps:$4 sm:$0xff]   ;;  %v872_v19 = vld [vmem:[#allocation5 + $0x30] ss:$12 sps:$4 sm:$0xff]  }
  0x49   : > { %749 = vmatpush3.bf16.msra.mxu1 %v855_v6  ;;  %441 = vmatpush1.bf16.msra.mxu0 %v856_v7  ;;  %v873_v20 = vld [vmem:[#allocation5 + $0x1c] ss:$12 sps:$4 sm:$0xff]   ;;  %v875_v21 = vld [vmem:[#allocation5 + $0x20] ss:$12 sps:$4 sm:$0xff]   ;;  %v876_v22 = vld [vmem:[#allocation5 + $0x18] ss:$12 sps:$4 sm:$0xff]  }
  0x4a   : > { %750 = vmatprep.subr.bf16.mxu1 %v1055_v0  ;;  %442 = vmatprep.subr.bf16.mxu0 %v857_v8  ;;  %v877_v23 = vld [vmem:[#allocation5 + $0x4] ss:$12 sps:$4 sm:$0xff]   ;;  %v879_v24 = vld [vmem:[#allocation5 + $0x8] ss:$12 sps:$4 sm:$0xff]   ;;  %v880_v26 = vld [vmem:[#allocation5] ss:$12 sps:$4 sm:$0xff]  }
  0x4b   : > { %v296_v29 = vshrl.u32 %v295_v28, 7  ;;  %v293_v32 = vld [vmem:[%s1310_s2] sm:$0x7]  ;;  %s701_s27 = sshll.u32 %s1200_s12, 2  ;;  %s730_s30 = sshll.u32 %s1041_s18, 6 }
  0x4c   : > { %s250_s6 = scalar_lea.vmem [#allocation7], %s701_s27  ;;  %s736_s8 = sshll.u32 %s1041_s18, 7 }
  0x4d   : > { %751 = vmatpush3.bf16.msra.mxu1 %v859_v9  ;;  %443 = vmatpush1.bf16.msra.mxu0 %v860_v10  ;;  %v305_v30 = vsub.s32 2, %v296_v29  ;;  %v297_v31 = vsub.s32 0, %v296_v29  ;;  %v301_v33 = vsub.s32 1, %v296_v29  ;;  %s550_s7 = sshll.u32 %s250_s6, 4  ;;  %s1225_s9 = scalar_lea.vmem [#allocation8], %s699_s21  ;;  %s1233_s7 = int_to_ptr.vmem [resolvable:$true] %s550_s7 }
  0x4e   : > { %752 = vmatprep.subr.bf16.mxu1 %v1055_v0  ;;  %444 = vmatprep.subr.bf16.mxu0 %v861_v11  ;;  %s566_s24 = sshll.u32 %s1225_s9, 4  ;;  %s1231_s11 = scalar_lea.hbm %s1311_s3, %s730_s30  ;;  %s1240_s24 = int_to_ptr.vmem [resolvable:$true] %s566_s24 }
  0x4f   : > { %v306_v34 = vrot.slane %v293_v32, %v305_v30  ;;  %v298_v35 = vrot.slane %v293_v32, %v297_v31  ;;  %v302_v37 = vrot.slane %v293_v32, %v301_v33  ;;  %s1238_s21 = scalar_lea.hbm %s1312_s4, %s736_s8  ;;  %s531_s22 = scalar_lea.sflag [#allocation4], %s1200_s12 }
  0x50   : > { %s935_s1 = scalar_lea.vmem %s1233_s7, 64  ;;  %s1058_s23 = smov [#allocation7]  }
  0x51   : > { %753 = vmatpush3.bf16.msra.mxu1 %v863_v12  ;;  %445 = vmatpush1.bf16.msra.mxu0 %v864_v13  ;;  %p936_p1 = scmp.ne.s32.totalorder %s1233_s7, %s935_s1  ;;  %s939_s25 = sshll.u32 %s1058_s23, 4  ;;  %s940_s25 = int_to_ptr.vmem [resolvable:$false] %s939_s25 }
  0x52   : > { %754 = vmatprep.subr.bf16.mxu1 %v1055_v0  ;;  %446 = vmatprep.subr.bf16.mxu0 %v865_v14  ;;  %s941_s27 = scalar_lea.vmem %s940_s25, 128  ;;  %p942_p0 = scmp.lt.s32.totalorder %s1233_s7, %s940_s25 }
  0x53   : > { %p937_p8 = pnand %p936_p1, %p1172_p13  ;;  %p943_p2 = scmp.lt.s32.totalorder %s941_s27, %s935_s1 }
  0x55   : > { %755 = vmatpush3.bf16.msra.mxu1 %v867_v15  ;;  %447 = vmatpush1.bf16.msra.mxu0 %v868_v16  ;;  %p938_p10 = pneg %p937_p8  ;;  %p944_p3 = por %p943_p2, %p942_p0 }
  0x56   : > { %756 = vmatprep.subr.bf16.mxu1 %v1055_v0  ;;  %448 = vmatprep.subr.bf16.mxu0 %v869_v17 }
  0x57   : > { %p945_p5 = pnand %p944_p3, %p938_p10 }
  0x59   : > { %757 = vmatpush3.bf16.msra.mxu1 %v871_v18  ;;  %449 = vmatpush1.bf16.msra.mxu0 %v872_v19 }
  0x5a   : > { %758 = vmatprep.subr.bf16.mxu1 %v1055_v0  ;;  %450 = vmatprep.subr.bf16.mxu0 %v873_v20 }
  0x5d   : > { %759 = vmatpush3.bf16.msra.mxu1 %v875_v21  ;;  %451 = vmatpush1.bf16.msra.mxu0 %v876_v22 }
  0x5e   : > { %760 = vmatprep.subr.bf16.mxu1 %v1055_v0  ;;  %452 = vmatprep.subr.bf16.mxu0 %v877_v23 }
  0x61   : > { %761 = vmatpush3.bf16.msra.mxu1 %v879_v24  ;;  %453 = vmatpush1.bf16.msra.mxu0 %v880_v26 }
  0x64   : > { %763 = vmatmul.mubr.bf16.vlgmr.msra.gmra.mxu1 %v260_v27  ;;  %471 = vmatmul.mubr.bf16.vlgmr.msra.gmra.mxu0 %v260_v27 }
 0x124   : > { %v513_v36 = vpop.f32.mrf.mxu1  ;;  %v472_v38 = vpop.f32.mrf.mxu0 }
 0x125   : > { %v514_v39 = vadd.f32 %v513_v36, %v306_v34  ;;  %v473_v40 = vadd.f32 %v472_v38, %v298_v35 }
 0x126   : > { %v764_v41 = vpop.f32.mrf.mxu1  ;;  %v474_v42 = vpop.f32.mrf.mxu0 }
 0x127   : > { %v519_v43 = vpack.c.bf16 %v473_v40, %v473_v40  ;;  %v475_v44 = vadd.f32 %v474_v42, %v302_v37 }
 0x128   : > { %v516_v45 = vpop.f32.mrf.mxu1  ;;  %v476_v46 = vpop.f32.mrf.mxu0 }
 0x129   : > { %520 = vst [vmem:[%s250_s6] sm:$0xf] %v519_v43  ;;  %v735_v47 = vpack.c.bf16 %v514_v39, %v475_v44 }
 0x12a   : > { %v765_v48 = vpop.f32.mrf.mxu1  ;;  %v477_v49 = vpop.f32.mrf.mxu0 }
 0x12b   : > { %948 = shalt.err (!%p945_p5)
}
 0x12c   : > { %s949_s30 = scalar_lea.hbm %s1231_s11, 64  ;;  %s953_s10 = scalar_lea.hbm %s1311_s3, 128 }
 0x12d   : > { %p950_p7 = scmp.ne.s32.totalorder %s1231_s11, %s949_s30  ;;  %p954_p9 = scmp.lt.s32.totalorder %s1231_s11, %s1311_s3 }
 0x12e   : > { %p955_p11 = scmp.lt.s32.totalorder %s953_s10, %s949_s30 }
 0x12f   : > { %p951_p6 = pnand %p950_p7, %p1172_p13 }
 0x130   : > { %p956_p12 = por %p955_p11, %p954_p9 }
 0x131   : > { %p952_p4 = pneg %p951_p6 }
 0x133   : > { %p957_p1 = pnand %p956_p12, %p952_p4 }
 0x135   : > { %960 = shalt.err (!%p957_p1)
}
 0x136   : > { %772 = dma.vmem_to_hbm [thread:$0]  (%p1172_p13), %s1233_s7, 64, %s1231_s11, %s531_s22   ;;  %529 = vst [vmem:[%s1225_s9] sm:$0xff] %v735_v47 }
 0x137   : > { %s536_s29 = scalar_lea.sflag [#allocation9], %s1200_s12  ;;  %s961_s1 = scalar_lea.vmem %s1240_s24, 128 }
 0x138   : > { %p962_p8 = scmp.ne.s32.totalorder %s1240_s24, %s961_s1  ;;  %s1059_s23 = smov [#allocation8]  }
 0x139   : > { %s965_s25 = sshll.u32 %s1059_s23, 4  ;;  %s966_s25 = int_to_ptr.vmem [resolvable:$false] %s965_s25 }
 0x13a   : > { %p963_p10 = pnand %p962_p8, %p1172_p13  ;;  %s967_s27 = scalar_lea.vmem %s966_s25, 256 }
 0x13b   : > { %p968_p2 = scmp.lt.s32.totalorder %s1240_s24, %s966_s25  ;;  %p969_p3 = scmp.lt.s32.totalorder %s967_s27, %s961_s1 }
 0x13c   : > { %p964_p0 = pneg %p963_p10 }
 0x13d   : > { %p970_p5 = por %p969_p3, %p968_p2 }
 0x13f   : > { %p971_p7 = pnand %p970_p5, %p964_p0 }
 0x141   : > { %974 = shalt.err (!%p971_p7)
}
 0x142   : > { %s975_s7 = scalar_lea.hbm %s1238_s21, 128  ;;  %s979_s11 = scalar_lea.hbm %s1312_s4, 256 }
 0x143   : > { %p976_p6 = scmp.ne.s32.totalorder %s1238_s21, %s975_s7  ;;  %p980_p11 = scmp.lt.s32.totalorder %s1238_s21, %s1312_s4 }
 0x144   : > { %p981_p12 = scmp.lt.s32.totalorder %s979_s11, %s975_s7 }
 0x145   : > { %p977_p4 = pnand %p976_p6, %p1172_p13 }
 0x146   : > { %p982_p1 = por %p981_p12, %p980_p11 }
 0x147   : > { %p978_p9 = pneg %p977_p4 }
 0x149   : > { %p983_p8 = pnand %p982_p1, %p978_p9 }
 0x14b   : > { %986 = shalt.err (!%p983_p8)
}
 0x14c   : > { %773 = dma.vmem_to_hbm [thread:$0]  (%p1172_p13), %s1240_s24, 128, %s1238_s21, %s536_s29  }
 0x14d PF: > { %s578_s6 = sand.u32 1, %s1029_s15   ;;  %p1326_p10 = scmp.ne.s32.totalorder %s1318_s26, 0 }
 0x14e   : > { %p1327_p0 = scmp.ge.s32.totalorder %s1049_s20, 2  ;;  %s579_s8 = scalar_lea.sflag [#allocation4], %s578_s6 }
 0x150   : > { %p785_p2 = pnand %p1327_p0, %p1326_p10 }
 0x152   : > { %p786_p3 = pneg %p785_p2 }
 0x154   : > { %1020 = dma.done.wait (%p786_p3), %s579_s8, 64  }
 0x155   : > { %1022 = vsyncadd (%p786_p3), %s579_s8, 4294967232  ;;  %s588_s10 = scalar_lea.sflag [#allocation9], %s578_s6 }
 0x156   : > { %1024 = dma.done.wait (%p786_p3), %s588_s10, 128  }
 0x157   : > { %1026 = vsyncadd (%p786_p3), %s588_s10, 4294967168  ;;  %s25_s20 = sadd.s32 1, %s1049_s20   ;;  %s1328_s15 = smov %s1033_s16 }
 0x158   : > { %p22_p5 = scmp.ge.s32.totalorder %s25_s20, 4   ;;  %s1329_s16 = smov %s1037_s17 }
 0x159   : > { %s1330_s17 = smov %s1181_s28  ;;  %s1331_s18 = smov %s1045_s19 }
 0x15a   : > { %s1332_s19 = smov %s1334_s5  ;;  %24 = sbr.rel (!%p22_p5) target bundleno = 11 (0xb), region = 98 }
 0x15f   :  { %593 = vsyncpa [#allocation3], 1 }
 0x160   :  { %595 = vsyncpa [#allocation3 + $0x1], 1 }
 0x161   :  { %596 = vsyncpa [#allocation6], 1 }
 0x162   :  { %597 = vsyncpa [#allocation4], 1 }
 0x163   :  { %599 = vsyncpa [#allocation4 + $0x1], 1 }
 0x164   :  { %600 = vsyncpa [#allocation9], 1 }
 0x165   :  { %602 = vsyncpa [#allocation9 + $0x1], 1 }

</bundles_post_ra>
